<compile_context>
chip_gen: v5e
topology: v5e:2x2
jax: 0.10.0
libtpu: 0.0.40
codegen_flags: <defaults>
</compile_context>

<pallas_src>
import functools
import math

import jax
import jax.numpy as jnp
from jax.experimental import pallas as pl
from jax.experimental.pallas import tpu as pltpu


# ---------------------------------------------------------------------------
# Tiling / VMEM helpers
# ---------------------------------------------------------------------------
@functools.lru_cache(maxsize=None)
def _vmem_budget():
    """Scoped-VMEM request: physical capacity minus headroom for Mosaic scratch.
    ~96 MiB on v5e/v6e (128 MiB parts), ~48 MiB on v7x (64 MiB part)."""
    cap = 64 * 1024 * 1024  # conservative default (v7x physical VMEM)
    try:
        info = pltpu.get_tpu_info()
        cap = int(getattr(info, "vmem_capacity_bytes", cap))
    except Exception:
        pass
    return max(32 * 1024 * 1024, (cap * 3) // 4)


@functools.lru_cache(maxsize=None)
def _tile_cap():
    # Bigger blocks where 128 MiB VMEM is available (amortize ~0.35us/grid-step),
    # conservative on v7x's halved VMEM.
    return 1024 if _vmem_budget() >= 72 * 1024 * 1024 else 512


def _pick_tile(dim, preferred, aligns):
    """Largest tile <= preferred dividing dim, preferring the given alignments
    (256 first for v6e/v7x MXU-shaped N/K tiles)."""
    if dim <= preferred:
        return dim
    for align in aligns:
        t = (preferred // align) * align
        while t >= align:
            if dim % t == 0:
                return t
            t -= align
    for t in range(min(preferred, dim), 0, -1):
        if dim % t == 0:
            return t
    # TODO(synk): ragged dims — pad + masked tail instead of one full-dim block.
    return dim


def _row_tile(M, dtype, tile_cap):
    row_align = 16 if dtype == jnp.bfloat16 else 8   # bf16 packs 16 rows/sublane group
    tm = _pick_tile(M, tile_cap, (row_align,))
    # Keep >=2 blocks on the parallel axis so v7x's second TensorCore has work.
    if M // tm < 2 and tm % (2 * row_align) == 0:
        tm //= 2
    return tm


# ---------------------------------------------------------------------------
# Kernel 1: plain tiled Linear (x @ W + b) — used for the fused Q|K|V projection
# ---------------------------------------------------------------------------
def _linear_kernel(x_ref, w_ref, b_ref, o_ref, acc_ref):
    k = pl.program_id(2)

    @pl.when(k == 0)
    def _():
        acc_ref[...] = jnp.zeros_like(acc_ref)

    # Native-dtype MXU matmul (bf16 fast path), f32 accumulation.
    acc_ref[...] += jnp.dot(x_ref[...], w_ref[...], preferred_element_type=jnp.float32)

    @pl.when(k == pl.num_programs(2) - 1)
    def _():
        o_ref[...] = (acc_ref[...] + b_ref[...].astype(jnp.float32)).astype(o_ref.dtype)


def linear(x, w, b, *, tile_cap=None):
    """x: (M, K), w: (K, N) [torch weight.T], b: (N,) f32 -> (M, N) in x.dtype."""
    tile_cap = tile_cap or _tile_cap()
    M, K = x.shape
    K2, N = w.shape
    assert K == K2
    tm = _row_tile(M, x.dtype, tile_cap)
    tn = _pick_tile(N, tile_cap, (256, 128))
    tk = _pick_tile(K, tile_cap, (256, 128))
    return pl.pallas_call(
        _linear_kernel,
        out_shape=jax.ShapeDtypeStruct((M, N), x.dtype),
        grid_spec=pltpu.PrefetchScalarGridSpec(
            num_scalar_prefetch=0,
            grid=(M // tm, N // tn, K // tk),
            in_specs=[
                pl.BlockSpec((tm, tk), lambda i, j, k: (i, k)),
                pl.BlockSpec((tk, tn), lambda i, j, k: (k, j)),
                pl.BlockSpec((1, tn), lambda i, j, k: (0, j)),
            ],
            out_specs=pl.BlockSpec((tm, tn), lambda i, j, k: (i, j)),
            scratch_shapes=[pltpu.VMEM((tm, tn), jnp.float32)],
        ),
        compiler_params=pltpu.CompilerParams(
            dimension_semantics=("parallel", "parallel", "arbitrary"),
            vmem_limit_bytes=_vmem_budget(),
        ),
    )(x, w, b.reshape(1, N))


# ---------------------------------------------------------------------------
# Kernel 2: multi-head attention, one batch (all heads) per grid step
# ---------------------------------------------------------------------------
def _attention_kernel(qkv_ref, o_ref, *, num_heads, scale):
    S, D3 = qkv_ref.shape
    d_model = D3 // 3
    dh = d_model // num_heads
    qkv = qkv_ref[...]                       # (S, 3*d_model), native dtype
    q = qkv[:, 0:d_model] * scale            # fold 1/sqrt(dh) into q (S*dh vs S*S mults)
    k = qkv[:, d_model:2 * d_model]
    v = qkv[:, 2 * d_model:3 * d_model]

    outs = []
    for h in range(num_heads):               # static unroll; all heads in one grid step
        qh = q[:, h * dh:(h + 1) * dh]
        kh = k[:, h * dh:(h + 1) * dh]
        vh = v[:, h * dh:(h + 1) * dh]
        # q @ k^T without materializing a transpose.
        s = jax.lax.dot_general(qh, kh, (((1,), (1,)), ((), ())),
                                preferred_element_type=jnp.float32)     # (S, S) f32
        m = jnp.max(s, axis=-1, keepdims=True)
        p = jnp.exp(s - m)
        attn = p * pl.reciprocal(jnp.sum(p, axis=-1, keepdims=True), approx=True)  # EUP
        outs.append(jnp.dot(attn.astype(vh.dtype), vh,
                            preferred_element_type=jnp.float32))        # (S, dh)
    # Lane-dense (S, d_model) slab: all heads written by one unmasked store.
    o_ref[...] = jnp.concatenate(outs, axis=-1).astype(o_ref.dtype)


def fused_attention(qkv, *, num_heads):
    """qkv: (batch, seq, 3*d_model) = [Q|K|V] on lanes -> (batch, seq, d_model)."""
    B, S, D3 = qkv.shape
    d_model = D3 // 3
    scale = 1.0 / math.sqrt(d_model // num_heads)
    kernel = functools.partial(_attention_kernel, num_heads=num_heads, scale=scale)
    # TODO(synk): flash-style KV-tiled online-softmax for long sequences (matters first
    # on v7x's 64 MiB VMEM); full-S blocks are fine at these model sizes.
    return pl.pallas_call(
        kernel,
        out_shape=jax.ShapeDtypeStruct((B, S, d_model), qkv.dtype),
        grid_spec=pltpu.PrefetchScalarGridSpec(
            num_scalar_prefetch=0,
            grid=(B,),
            in_specs=[pl.BlockSpec((None, S, D3), lambda b: (b, 0, 0))],
            out_specs=pl.BlockSpec((None, S, d_model), lambda b: (b, 0, 0)),
        ),
        compiler_params=pltpu.CompilerParams(
            dimension_semantics=("parallel",),
            vmem_limit_bytes=_vmem_budget(),
        ),
    )(qkv)


# ---------------------------------------------------------------------------
# Shared LayerNorm epilogue (torch.std semantics: ddof=1, eps added to std)
# ---------------------------------------------------------------------------
def _layernorm_f32(s, alpha_ref, beta_ref, epsilon):
    d_model = s.shape[-1]
    mean = jnp.mean(s, axis=-1, keepdims=True)
    cen = s - mean
    var = jnp.sum(cen * cen, axis=-1, keepdims=True) * (1.0 / (d_model - 1))
    inv = 1.0 / (jnp.sqrt(var) + epsilon)          # exact reciprocal for LN accuracy
    return alpha_ref[...].astype(jnp.float32) * (cen * inv) + beta_ref[...].astype(jnp.float32)


# ---------------------------------------------------------------------------
# Kernel 3: matmul + bias + residual-add + LayerNorm (w_concat / AddNorm[0])
# ---------------------------------------------------------------------------
def _matmul_addnorm_kernel(x_ref, w_ref, b_ref, res_ref, alpha_ref, beta_ref,
                           o_ref, acc_ref, *, epsilon):
    k = pl.program_id(1)

    @pl.when(k == 0)
    def _():
        acc_ref[...] = jnp.zeros_like(acc_ref)

    acc_ref[...] += jnp.dot(x_ref[...], w_ref[...], preferred_element_type=jnp.float32)

    @pl.when(k == pl.num_programs(1) - 1)
    def _():
        s = acc_ref[...] + b_ref[...].astype(jnp.float32) + res_ref[...].astype(jnp.float32)
        o_ref[...] = _layernorm_f32(s, alpha_ref, beta_ref, epsilon).astype(o_ref.dtype)


def matmul_addnorm(x, w, b, res, alpha, beta, *, epsilon=1e-6, out_dtype=None,
                   tile_cap=None):
    """LayerNorm(res + x @ w + b).  N == d_model stays a full lane-dense block."""
    tile_cap = tile_cap or _tile_cap()
    M, K = x.shape
    _, N = w.shape
    out_dtype = out_dtype or x.dtype
    tm = _row_tile(M, x.dtype, tile_cap)
    tk = _pick_tile(K, tile_cap, (256, 128))
    kernel = functools.partial(_matmul_addnorm_kernel, epsilon=epsilon)
    return pl.pallas_call(
        kernel,
        out_shape=jax.ShapeDtypeStruct((M, N), out_dtype),
        grid_spec=pltpu.PrefetchScalarGridSpec(
            num_scalar_prefetch=0,
            grid=(M // tm, K // tk),
            in_specs=[
                pl.BlockSpec((tm, tk), lambda i, k: (i, k)),
                pl.BlockSpec((tk, N), lambda i, k: (k, 0)),
                pl.BlockSpec((1, N), lambda i, k: (0, 0)),
                pl.BlockSpec((tm, N), lambda i, k: (i, 0)),   # residual, resident per i
                pl.BlockSpec((1, N), lambda i, k: (0, 0)),
                pl.BlockSpec((1, N), lambda i, k: (0, 0)),
            ],
            out_specs=pl.BlockSpec((tm, N), lambda i, k: (i, 0)),
            scratch_shapes=[pltpu.VMEM((tm, N), jnp.float32)],
        ),
        compiler_params=pltpu.CompilerParams(
            dimension_semantics=("parallel", "arbitrary"),
            vmem_limit_bytes=_vmem_budget(),
        ),
    )(x, w, b.reshape(1, N), res, alpha.reshape(1, N), beta.reshape(1, N))


# ---------------------------------------------------------------------------
# Kernel 4: fused FFN (linear1 + ReLU + linear2) + residual-add + LayerNorm
# ---------------------------------------------------------------------------
def _ffn_addnorm_kernel(x_ref, w1_ref, b1_ref, w2_ref, b2_ref, alpha_ref, beta_ref,
                        o_ref, acc_ref, *, epsilon):
    f = pl.program_id(1)

    @pl.when(f == 0)
    def _():
        acc_ref[...] = jnp.zeros_like(acc_ref)

    # hidden chunk for this d_ff tile; never leaves VMEM
    h = jnp.dot(x_ref[...], w1_ref[...], preferred_element_type=jnp.float32)
    h = jnp.maximum(h + b1_ref[...].astype(jnp.float32), 0.0)
    acc_ref[...] += jnp.dot(h.astype(w2_ref.dtype), w2_ref[...],
                            preferred_element_type=jnp.float32)

    @pl.when(f == pl.num_programs(1) - 1)
    def _():
        # x_ref doubles as the residual (same block across all f steps).
        s = acc_ref[...] + b2_ref[...].astype(jnp.float32) + x_ref[...].astype(jnp.float32)
        o_ref[...] = _layernorm_f32(s, alpha_ref, beta_ref, epsilon).astype(o_ref.dtype)


def ffn_addnorm(x, w1, b1, w2, b2, alpha, beta, *, epsilon=1e-6, out_dtype=None,
                tile_cap=None):
    """LayerNorm(x + relu(x @ w1 + b1) @ w2 + b2).  d_ff is the tiled reduction axis."""
    tile_cap = tile_cap or _tile_cap()
    M, D = x.shape
    _, F = w1.shape
    out_dtype = out_dtype or x.dtype
    tm = _row_tile(M, x.dtype, tile_cap)
    tf = _pick_tile(F, tile_cap, (256, 128))
    kernel = functools.partial(_ffn_addnorm_kernel, epsilon=epsilon)
    return pl.pallas_call(
        kernel,
        out_shape=jax.ShapeDtypeStruct((M, D), out_dtype),
        grid_spec=pltpu.PrefetchScalarGridSpec(
            num_scalar_prefetch=0,
            grid=(M // tm, F // tf),
            in_specs=[
                pl.BlockSpec((tm, D), lambda i, f: (i, 0)),   # x (and residual)
                pl.BlockSpec((D, tf), lambda i, f: (0, f)),   # w1 tile
                pl.BlockSpec((1, tf), lambda i, f: (0, f)),   # b1 tile
                pl.BlockSpec((tf, D), lambda i, f: (f, 0)),   # w2 tile
                pl.BlockSpec((1, D), lambda i, f: (0, 0)),    # b2
                pl.BlockSpec((1, D), lambda i, f: (0, 0)),    # ln alpha
                pl.BlockSpec((1, D), lambda i, f: (0, 0)),    # ln bias
            ],
            out_specs=pl.BlockSpec((tm, D), lambda i, f: (i, 0)),
            scratch_shapes=[pltpu.VMEM((tm, D), jnp.float32)],
        ),
        compiler_params=pltpu.CompilerParams(
            dimension_semantics=("parallel", "arbitrary"),
            vmem_limit_bytes=_vmem_budget(),
        ),
    )(x, w1, b1.reshape(1, F), w2, b2.reshape(1, D),
      alpha.reshape(1, D), beta.reshape(1, D))


# ---------------------------------------------------------------------------
# OriginalEncoderBlock forward (eval mode)
# ---------------------------------------------------------------------------
def encoder_block_forward(x, params, *, num_heads, epsilon=1e-6,
                          compute_dtype=jnp.bfloat16):
    """Returns (LayerNorm'd output, loss).

    Dropout layers are identity (eval-mode forward).  In eval mode the two
    `mha_block(x)` calls of the PyTorch forward produce identical outputs, so the
    attention path is computed once and reused.  Matmuls run in `compute_dtype`
    (bf16 by default for native MXU throughput) with f32 accumulation/epilogues.
    """
    batch, seq_len, d_model = x.shape
    rows = batch * seq_len
    out_dtype = x.dtype
    cd = compute_dtype

    xc = x.astype(cd).reshape(rows, d_model)

    # --- fused Q|K|V projection: one kernel, x read from HBM once, 3x wider N ---
    wqkv = jnp.concatenate([params["wq"], params["wk"], params["wv"]], axis=1).astype(cd)
    bqkv = jnp.concatenate([params["bq"], params["bk"], params["bv"]]).astype(jnp.float32)
    qkv = linear(xc, wqkv, bqkv)

    # --- multi-head attention directly on the (batch, seq, 3*d_model) slab ---
    heads = fused_attention(qkv.reshape(batch, seq_len, 3 * d_model), num_heads=num_heads)
    heads = heads.reshape(rows, d_model)

    # TODO(synk): `SCL()` is referenced but never defined in the provided source,
    # so the auxiliary loss cannot be translated; return a 0.0 placeholder.
    loss = jnp.zeros((), jnp.float32)

    # --- w_concat projection with AddNorm[0] fused into the epilogue ---
    h1 = matmul_addnorm(
        heads, params["wc"].astype(cd), params["bc"].astype(jnp.float32), xc,
        params["ln1_alpha"].astype(jnp.float32), params["ln1_bias"].astype(jnp.float32),
        epsilon=epsilon, out_dtype=cd)

    # --- FFN (linear1 + ReLU + linear2) with AddNorm[1] fused; hidden stays in VMEM ---
    h2 = ffn_addnorm(
        h1, params["w1"].astype(cd), params["b1"].astype(jnp.float32),
        params["w2"].astype(cd), params["b2"].astype(jnp.float32),
        params["ln2_alpha"].astype(jnp.float32), params["ln2_bias"].astype(jnp.float32),
        epsilon=epsilon, out_dtype=out_dtype)

    return h2.reshape(batch, seq_len, d_model), loss


# ---------------------------------------------------------------------------
# Pure-JAX reference and deterministic parameter init
# ---------------------------------------------------------------------------
def _reference_forward(x, params, *, num_heads, epsilon=1e-6):
    batch, seq_len, d_model = x.shape
    d_head = d_model // num_heads

    def lin(t, w, b):
        return t @ w + b

    def layernorm(t, alpha, bias):
        mean = jnp.mean(t, axis=-1, keepdims=True)
        std = jnp.sqrt(jnp.sum((t - mean) ** 2, axis=-1, keepdims=True) / (d_model - 1))
        return alpha * (t - mean) / (std + epsilon) + bias

    q = lin(x, params["wq"], params["bq"])
    k = lin(x, params["wk"], params["bk"])
    v = lin(x, params["wv"], params["bv"])

    def split(t):
        return t.reshape(batch, seq_len, num_heads, d_head).transpose(0, 2, 1, 3)

    qh, kh, vh = split(q), split(k), split(v)
    scores = jnp.einsum("bhqd,bhkd->bhqk", qh, kh) / math.sqrt(d_head)
    probs = jax.nn.softmax(scores, axis=-1)
    heads = jnp.einsum("bhqk,bhkd->bhqd", probs, vh)
    heads = heads.transpose(0, 2, 1, 3).reshape(batch, seq_len, d_model)
    attn_out = lin(heads, params["wc"], params["bc"])

    h1 = layernorm(x + attn_out, params["ln1_alpha"], params["ln1_bias"])
    ff = lin(jax.nn.relu(lin(h1, params["w1"], params["b1"])), params["w2"], params["b2"])
    return layernorm(h1 + ff, params["ln2_alpha"], params["ln2_bias"])


def init_params(key, d_model, d_ff):
    keys = jax.random.split(key, 6)

    def lin_init(k, fan_in, fan_out):
        kw, kb = jax.random.split(k)
        lim = 1.0 / math.sqrt(fan_in)
        w = jax.random.uniform(kw, (fan_in, fan_out), jnp.float32, -lim, lim)
        b = jax.random.uniform(kb, (fan_out,), jnp.float32, -lim, lim)
        return w, b

    wq, bq = lin_init(keys[0], d_model, d_model)
    wk, bk = lin_init(keys[1], d_model, d_model)
    wv, bv = lin_init(keys[2], d_model, d_model)
    wc, bc = lin_init(keys[3], d_model, d_model)
    w1, b1 = lin_init(keys[4], d_model, d_ff)
    w2, b2 = lin_init(keys[5], d_ff, d_model)
    ones = jnp.ones((d_model,), jnp.float32)
    zeros = jnp.zeros((d_model,), jnp.float32)
    return dict(wq=wq, bq=bq, wk=wk, bk=bk, wv=wv, bv=bv, wc=wc, bc=bc,
                w1=w1, b1=b1, w2=w2, b2=b2,
                ln1_alpha=ones, ln1_bias=zeros, ln2_alpha=ones, ln2_bias=zeros)


if __name__ == "__main__":
    batch, seq_len, d_model, num_heads, d_ff = 2, 8, 32, 4, 128
    epsilon = 1e-6
    key = jax.random.PRNGKey(0)
    kx, kp, ky = jax.random.split(key, 3)
    x = jax.random.normal(kx, (batch, seq_len, d_model), dtype=jnp.float32)
    params = init_params(kp, d_model, d_ff)

    ref = _reference_forward(x, params, num_heads=num_heads, epsilon=epsilon)

    # --- tight-ish check of the fused matmul + residual + LayerNorm kernel (f32) ---
    y = jax.random.normal(ky, (batch * seq_len, d_model), dtype=jnp.float32)
    fused = matmul_addnorm(y, params["wc"], params["bc"], x.reshape(-1, d_model),
                           params["ln1_alpha"], params["ln1_bias"], epsilon=epsilon)
    fused = jax.block_until_ready(fused)
    s = x.reshape(-1, d_model) + jnp.dot(y, params["wc"],
                                         precision=jax.lax.Precision.HIGHEST) + params["bc"]
    mean = jnp.mean(s, axis=-1, keepdims=True)
    std = jnp.sqrt(jnp.sum((s - mean) ** 2, axis=-1, keepdims=True) / (d_model - 1))
    ln_ref = params["ln1_alpha"] * (s - mean) / (std + epsilon) + params["ln1_bias"]
    assert jnp.allclose(fused, ln_ref, atol=1e-2, rtol=1e-2), "matmul+addnorm mismatch"

    # --- f32 end-to-end check (precision-reference path) ---
    out_f32, loss = encoder_block_forward(x, params, num_heads=num_heads,
                                          epsilon=epsilon, compute_dtype=jnp.float32)
    out_f32 = jax.block_until_ready(out_f32)
    assert out_f32.shape == x.shape
    assert loss.shape == ()
    assert jnp.allclose(out_f32, ref, atol=5e-2, rtol=5e-2), "encoder block (f32) mismatch"

    # --- bf16 fast-path end-to-end check (native MXU dtype) ---
    out_bf16, _ = encoder_block_forward(x, params, num_heads=num_heads,
                                        epsilon=epsilon, compute_dtype=jnp.bfloat16)
    out_bf16 = jax.block_until_ready(out_bf16)
    assert jnp.allclose(out_bf16, ref, atol=1.5e-1, rtol=1.5e-1), \
        "encoder block (bf16) mismatch"

    print("KERNEL_OK")
</pallas_src>

<mosaic_0001>
module attributes {stable_mosaic.version = 11 : i64} {
  func.func @_matmul_addnorm_kernel(%arg0: i32, %arg1: i32, %arg2: memref<8x32xf32, #tpu.memory_space<vmem>>, %arg3: memref<32x32xf32, #tpu.memory_space<vmem>>, %arg4: memref<1x32xf32, #tpu.memory_space<vmem>>, %arg5: memref<8x32xf32, #tpu.memory_space<vmem>>, %arg6: memref<1x32xf32, #tpu.memory_space<vmem>>, %arg7: memref<1x32xf32, #tpu.memory_space<vmem>>, %arg8: memref<8x32xf32, #tpu.memory_space<vmem>>, %arg9: memref<8x32xf32, #tpu.memory_space<vmem>>) attributes {dimension_semantics = [#tpu.dimension_semantics<parallel>, #tpu.dimension_semantics<arbitrary>], iteration_bounds = array<i64: 2, 1>, scalar_prefetch = 0 : i64, scratch_operands = 1 : i64, tpu.core_type = #tpu.core_type<tc>, window_params = [{transform_indices = @transform_0, window_bounds = array<i64: 8, 32>}, {transform_indices = @transform_1, window_bounds = array<i64: 32, 32>}, {pipeline_mode = #tpu.pipeline_mode<synchronous>, transform_indices = @transform_2, window_bounds = array<i64: 1, 32>}, {transform_indices = @transform_3, window_bounds = array<i64: 8, 32>}, {pipeline_mode = #tpu.pipeline_mode<synchronous>, transform_indices = @transform_4, window_bounds = array<i64: 1, 32>}, {pipeline_mode = #tpu.pipeline_mode<synchronous>, transform_indices = @transform_5, window_bounds = array<i64: 1, 32>}, {transform_indices = @transform_6, window_bounds = array<i64: 8, 32>}]} {
    %c0_i32 = arith.constant 0 : i32
    %0 = arith.cmpi eq, %arg1, %c0_i32 : i32
    %1 = arith.extui %0 : i1 to i32
    %c0_i32_0 = arith.constant 0 : i32
    %2 = arith.cmpi ne, %1, %c0_i32_0 : i32
    scf.if %2 {
      %cst_10 = arith.constant 0.000000e+00 : f32
      %12 = vector.broadcast %cst_10 : f32 to vector<8x32xf32>
      %c0_11 = arith.constant 0 : index
      %c0_12 = arith.constant 0 : index
      %13 = vector.load %arg9[%c0_11, %c0_12] : memref<8x32xf32, #tpu.memory_space<vmem>>, vector<8x32xf32>
      tpu.vector_store %arg9[%c0_11, %c0_12], %12 {strides = array<i32>} : memref<8x32xf32, #tpu.memory_space<vmem>>, vector<8x32xf32>,
    } else {
    }
    %c0 = arith.constant 0 : index
    %c0_1 = arith.constant 0 : index
    %3 = vector.load %arg9[%c0, %c0_1] : memref<8x32xf32, #tpu.memory_space<vmem>>, vector<8x32xf32>
    %c0_2 = arith.constant 0 : index
    %c0_3 = arith.constant 0 : index
    %4 = vector.load %arg2[%c0_2, %c0_3] : memref<8x32xf32, #tpu.memory_space<vmem>>, vector<8x32xf32>
    %c0_4 = arith.constant 0 : index
    %c0_5 = arith.constant 0 : index
    %5 = vector.load %arg3[%c0_4, %c0_5] : memref<32x32xf32, #tpu.memory_space<vmem>>, vector<32x32xf32>
    %cst = arith.constant dense<0.000000e+00> : vector<8x32xf32>
    %6 = tpu.matmul %4, %5, %cst {dimension_numbers = #tpu.dot_dimension_numbers<[1], [0], [0], [1], [0, 0, 1, 1], [], []>} : vector<8x32xf32>, vector<32x32xf32>, vector<8x32xf32> -> vector<8x32xf32>
    %7 = arith.addf %3, %6 : vector<8x32xf32>
    %c0_6 = arith.constant 0 : index
    %c0_7 = arith.constant 0 : index
    %8 = vector.load %arg9[%c0_6, %c0_7] : memref<8x32xf32, #tpu.memory_space<vmem>>, vector<8x32xf32>
    tpu.vector_store %arg9[%c0_6, %c0_7], %7 {strides = array<i32>} : memref<8x32xf32, #tpu.memory_space<vmem>>, vector<8x32xf32>,
    %c0_i32_8 = arith.constant 0 : i32
    %9 = arith.cmpi eq, %arg1, %c0_i32_8 : i32
    %10 = arith.extui %9 : i1 to i32
    %c0_i32_9 = arith.constant 0 : i32
    %11 = arith.cmpi ne, %10, %c0_i32_9 : i32
    scf.if %11 {
      %c0_10 = arith.constant 0 : index
      %c0_11 = arith.constant 0 : index
      %12 = vector.load %arg9[%c0_10, %c0_11] : memref<8x32xf32, #tpu.memory_space<vmem>>, vector<8x32xf32>
      %c0_12 = arith.constant 0 : index
      %c0_13 = arith.constant 0 : index
      %13 = vector.load %arg4[%c0_12, %c0_13] : memref<1x32xf32, #tpu.memory_space<vmem>>, vector<1x32xf32>
      %14 = vector.broadcast %13 : vector<1x32xf32> to vector<8x32xf32>
      %15 = arith.addf %12, %14 : vector<8x32xf32>
      %c0_14 = arith.constant 0 : index
      %c0_15 = arith.constant 0 : index
      %16 = vector.load %arg5[%c0_14, %c0_15] : memref<8x32xf32, #tpu.memory_space<vmem>>, vector<8x32xf32>
      %17 = arith.addf %15, %16 : vector<8x32xf32>
      %cst_16 = arith.constant dense<0.000000e+00> : vector<8xf32>
      %18 = vector.multi_reduction <add>, %17, %cst_16 [1] : vector<8x32xf32> to vector<8xf32>
      %19 = vector.shape_cast %18 : vector<8xf32> to vector<8x1xf32>
      %cst_17 = arith.constant 3.200000e+01 : f32
      %20 = vector.broadcast %cst_17 : f32 to vector<8x1xf32>
      %21 = arith.divf %19, %20 : vector<8x1xf32>
      %22 = vector.broadcast %21 : vector<8x1xf32> to vector<8x32xf32>
      %23 = arith.subf %17, %22 : vector<8x32xf32>
      %24 = arith.mulf %23, %23 : vector<8x32xf32>
      %cst_18 = arith.constant dense<0.000000e+00> : vector<8xf32>
      %25 = vector.multi_reduction <add>, %24, %cst_18 [1] : vector<8x32xf32> to vector<8xf32>
      %26 = vector.shape_cast %25 : vector<8xf32> to vector<8x1xf32>
      %cst_19 = arith.constant 0.0322580636 : f32
      %27 = vector.broadcast %cst_19 : f32 to vector<8x1xf32>
      %28 = arith.mulf %26, %27 : vector<8x1xf32>
      %29 = math.sqrt %28 : vector<8x1xf32>
      %cst_20 = arith.constant 9.99999997E-7 : f32
      %30 = vector.broadcast %cst_20 : f32 to vector<8x1xf32>
      %31 = arith.addf %29, %30 : vector<8x1xf32>
      %cst_21 = arith.constant 1.000000e+00 : f32
      %32 = vector.broadcast %cst_21 : f32 to vector<8x1xf32>
      %33 = arith.divf %32, %31 : vector<8x1xf32>
      %c0_22 = arith.constant 0 : index
      %c0_23 = arith.constant 0 : index
      %34 = vector.load %arg6[%c0_22, %c0_23] : memref<1x32xf32, #tpu.memory_space<vmem>>, vector<1x32xf32>
      %35 = vector.broadcast %33 : vector<8x1xf32> to vector<8x32xf32>
      %36 = arith.mulf %23, %35 : vector<8x32xf32>
      %37 = vector.broadcast %34 : vector<1x32xf32> to vector<8x32xf32>
      %38 = arith.mulf %37, %36 : vector<8x32xf32>
      %c0_24 = arith.constant 0 : index
      %c0_25 = arith.constant 0 : index
      %39 = vector.load %arg7[%c0_24, %c0_25] : memref<1x32xf32, #tpu.memory_space<vmem>>, vector<1x32xf32>
      %40 = vector.broadcast %39 : vector<1x32xf32> to vector<8x32xf32>
      %41 = arith.addf %38, %40 : vector<8x32xf32>
      %c0_26 = arith.constant 0 : index
      %c0_27 = arith.constant 0 : index
      %42 = vector.load %arg8[%c0_26, %c0_27] : memref<8x32xf32, #tpu.memory_space<vmem>>, vector<8x32xf32>
      tpu.vector_store %arg8[%c0_26, %c0_27], %41 {strides = array<i32>} : memref<8x32xf32, #tpu.memory_space<vmem>>, vector<8x32xf32>,
    } else {
    }
    return
  }
  func.func @transform_0(%arg0: i32, %arg1: i32) -> (i32, i32) {
    %c0_i32 = arith.constant 0 : i32
    return %arg0, %arg1 : i32, i32
  }
  func.func @transform_1(%arg0: i32, %arg1: i32) -> (i32, i32) {
    %c0_i32 = arith.constant 0 : i32
    %c0_i32_0 = arith.constant 0 : i32
    return %arg1, %c0_i32 : i32, i32
  }
  func.func @transform_2(%arg0: i32, %arg1: i32) -> (i32, i32) {
    %c0_i32 = arith.constant 0 : i32
    %c0_i32_0 = arith.constant 0 : i32
    %c0_i32_1 = arith.constant 0 : i32
    return %c0_i32, %c0_i32_0 : i32, i32
  }
  func.func @transform_3(%arg0: i32, %arg1: i32) -> (i32, i32) {
    %c0_i32 = arith.constant 0 : i32
    %c0_i32_0 = arith.constant 0 : i32
    return %arg0, %c0_i32 : i32, i32
  }
  func.func @transform_4(%arg0: i32, %arg1: i32) -> (i32, i32) {
    %c0_i32 = arith.constant 0 : i32
    %c0_i32_0 = arith.constant 0 : i32
    %c0_i32_1 = arith.constant 0 : i32
    return %c0_i32, %c0_i32_0 : i32, i32
  }
  func.func @transform_5(%arg0: i32, %arg1: i32) -> (i32, i32) {
    %c0_i32 = arith.constant 0 : i32
    %c0_i32_0 = arith.constant 0 : i32
    %c0_i32_1 = arith.constant 0 : i32
    return %c0_i32, %c0_i32_0 : i32, i32
  }
  func.func @transform_6(%arg0: i32, %arg1: i32) -> (i32, i32) {
    %c0_i32 = arith.constant 0 : i32
    %c0_i32_0 = arith.constant 0 : i32
    return %arg0, %c0_i32 : i32, i32
  }
}

</mosaic_0001>

<bundles_post_ra>
// kernel: tpu_custom_call.1
= control target key start
LH: loop header
LB: loop body
LE: loop exit
PB: predicated region body
PF: predicated region fallthrough
CT: control target
= control target key end

     0   :  { %11 = vsyncpa [#allocation4], 0  ;;  %s1096_s0 = inlined_call_operand.hbm [shape: f32[16,32], index: 0, kind: input, shape index: {}]   ;;  %s1097_s1 = inlined_call_operand.hbm [shape: f32[32,32], index: 1, kind: input, shape index: {}]   ;;  %s1098_s2 = inlined_call_operand.vmem [shape: f32[1,32], index: 2, kind: input, shape index: {}]   ;;  %s1099_s3 = inlined_call_operand.hbm [shape: f32[16,32], index: 3, kind: input, shape index: {}]   ;;  %s1100_s4 = inlined_call_operand.vmem [shape: f32[1,32], index: 4, kind: input, shape index: {}]   ;;  %s1101_s5 = inlined_call_operand.vmem [shape: f32[1,32], index: 5, kind: input, shape index: {}]   ;;  %s1102_s6 = inlined_call_operand.hbm [shape: f32[16,32], index: 6, kind: output, shape index: {}]  }
   0x1   :  { %13 = vsyncpa [#allocation4 + $0x1], 0 }
   0x2   :  { %14 = vsyncpa [#allocation7], 0 }
   0x3   :  { %15 = vsyncpa [#allocation5], 0 }
   0x4   :  { %17 = vsyncpa [#allocation5 + $0x1], 0  ;;  %s911_s21 = smov 0   ;;  %s913_s22 = smov 0  }
   0x5   :  { %s915_s23 = smov 0   ;;  %s917_s24 = smov 0  }
   0x6   :  { %s919_s25 = smov 0   ;;  %s921_s26 = smov 0  }
   0x7 LB: > { %1105 = sst [smem:[#allocation14_spill]] %s865_s25  ;;  %s942_s27 = sadd.s32 4294967295, %s869_s26   ;;  %s869_s26 = sphi %s921_s26, %s23_s26   ;;  %s865_s25 = sphi %s919_s25, %s1114_s25   ;;  %s861_s24 = sphi %s917_s24, %s1113_s24   ;;  %s857_s23 = sphi %s915_s23, %s1117_s23   ;;  %s853_s22 = sphi %s913_s22, %s1116_s22   ;;  %s849_s21 = sphi %s911_s21, %s1115_s21  }
   0x8   : > { %s580_s28 = sadd.s32 4294967294, %s869_s26   ;;  %s35_s29 = sadd.s32 1, %s865_s25 }
   0x9   : > { %s44_s30 = sadd.s32 1, %s857_s23  ;;  %p37_p0 = scmp.ge.s32.totalorder %s35_s29, 2 }
   0xa   : > { %p51_p1 = scmp.ne.s32.totalorder %s857_s23, %s853_s22  ;;  %p52_p2 = scmp.eq.s32.totalorder %s869_s26, 0 }
   0xb   : > { %p57_p3 = scmp.ne.s32.totalorder %s853_s22, %s849_s21  ;;  %s1119_s29 = smov (%p37_p0, %s35_s29), 0 }
   0xc   : > { %1106 = sst [smem:[#allocation15_spill]] %s1119_s29  ;;  %p954_p4 = por %p52_p2, %p51_p1 }
   0xd   : > { %p196_p5 = scmp.eq.s32.totalorder %s942_s27, 1  ;;  %s39_s8 = ssub.s32 %s865_s25, %s1119_s29 }
   0xe   : > { %p202_p6 = scmp.eq.s32.totalorder %s580_s28, 1  ;;  %p42_p7 = scmp.eq.s32.totalorder %s39_s8, 0 }
   0xf   : > { %p961_p8 = por %p196_p5, %p51_p1  ;;  %p583_p10 = scmp.ge.s32.totalorder %s869_s26, 2 }
  0x10   : > { %p968_p9 = por %p202_p6, %p57_p3  ;;  %p624_p11 = scmp.lt.s32.totalorder %s869_s26, 2 }
  0x11   : > { %s973_s11 = scalar_select %p42_p7, %s857_s23, %s44_s30  }
  0x12   : > { %s248_s12 = sand.u32 1, %s869_s26   ;;  %s250_s13 = sand.u32 1, %s857_s23  }
  0x13   : > { %s584_s14 = sshll.u32 %s250_s13, 3  ;;  %s585_s15 = sshll.u32 %s865_s25, 3 }
  0x14   : > { %s257_s18 = scalar_lea.hbm %s1096_s0, %s585_s15  ;;  %s252_s19 = scalar_lea.vmem [#allocation3], %s584_s14 }
  0x15   : > { %s261_s20 = sshll.u32 %s252_s19, 4  ;;  %s259_s28 = sshll.u32 %s257_s18, 4  ;;  %s262_s20 = int_to_ptr.vmem [resolvable:$true] %s261_s20  ;;  %s260_s28 = int_to_ptr.hbm [resolvable:$true] %s259_s28 }
  0x16   : > { %p985_p12 = pnand %p624_p11, %p954_p4  ;;  %s276_s13 = scalar_lea.hbm %s1099_s3, %s585_s15 }
  0x17   : > { %s249_s25 = scalar_lea.sflag [#allocation4], %s248_s12  ;;  %p58_p13 = scmp.eq.s32.totalorder %s942_s27, 0 }
  0x18   : > { %615 = dma.hbm_to_vmem [thread:$0]  (!%p985_p12), %s260_s28, 128, %s262_s20, %s249_s25  }
  0x19   : > { %p581_p0 = scmp.ge.s32.totalorder %s869_s26, 1  ;;  %p209_p1 = scmp.lt.s32.totalorder %s869_s26, 3 }
  0x1a   : > { %p1002_p2 = por %p58_p13, %p57_p3  ;;  %s223_s18 = sshll.u32 %s1097_s1, 4  ;;  %s224_s18 = int_to_ptr.hbm [resolvable:$true] %s223_s18 }
  0x1b   : > { %p1009_p4 = pnand %p581_p0, %p209_p1  ;;  %s871_s12 = smov [#allocation6]  }
  0x1c   : > { %s225_s15 = sshll.u32 %s871_s12, 4  ;;  %s278_s19 = sshll.u32 %s276_s13, 4  ;;  %s226_s15 = int_to_ptr.vmem [resolvable:$true] %s225_s15  ;;  %s279_s19 = int_to_ptr.hbm [resolvable:$true] %s278_s19 }
  0x1d   : > { %p608_p5 = pneg %p1009_p4  ;;  %s272_s20 = scalar_lea.vmem [#allocation8], %s584_s14 }
  0x1e   : > { %s280_s28 = sshll.u32 %s272_s20, 4  ;;  %s872_s8 = smov 128   ;;  %s281_s28 = int_to_ptr.vmem [resolvable:$true] %s280_s28 }
  0x1f   : > { %p609_p3 = pnand %p608_p5, %p58_p13  ;;  %s873_s16 = smov 8  }
  0x20   : > { %618 = dma.hbm_to_vmem [thread:$0]  (!%p985_p12), %s279_s19, 128, %s281_s28, %s249_s25  }
  0x21   : > { %611 = dma.hbm_to_vmem [thread:$0]  (!%p609_p3), %s224_s18, 512, %s226_s15, [#allocation7], %s872_s8, %s872_s8, %s873_s16  }
  0x22   : > { %289 = sbr.rel (%p1009_p4) target bundleno = 483 (0x1e3), region = 44  ;;  %s291_s17 = sand.u32 (!%p1009_p4), 1, %s942_s27  }
  0x23   : > { %s293_s12 = sand.u32 (!%p1009_p4), 1, %s853_s22   ;;  %s292_s14 = scalar_lea.sflag (!%p1009_p4), [#allocation4], %s291_s17 }
  0x24   : > { %s1025_s13 = sshll.u32 (!%p1009_p4), %s293_s12, 3 }
  0x25   : > { %s295_s20 = scalar_lea.vmem (!%p1009_p4), [#allocation3], %s1025_s13 }
  0x27   : > { %832 = dma.done.wait (%p1002_p2), %s292_s14, 128  }
  0x28   : > { %834 = vsyncadd (%p1002_p2), %s292_s14, 4294967168 }
  0x29   : > { %836 = dma.done.wait (%p58_p13), [#allocation7], 512  }
  0x2a   : > { %838 = vsyncadd (%p58_p13), [#allocation7], 4294966784  ;;  %s310_s25 = scalar_lea.vmem [#allocation8], %s1025_s13 }
  0x2b   : > { %840 = dma.done.wait (%p1002_p2), %s292_s14, 128  }
  0x2c   : > { %842 = vsyncadd (%p1002_p2), %s292_s14, 4294967168  ;;  %vm350_vm0 = vcmask 261120   ;;  %v874_v0 = vmov 0.0   ;;  %v357_v1 = vld [vmem:[#allocation6 + $0x18] sm:$0xff]  ;;  %v356_v2 = vld [vmem:[#allocation6 + $0x10] sm:$0xff]  ;;  %v875_v15 = vmov 32.0  }
  0x2d   : > { %351 = vst.msk [vmem:[#allocation2] sm:$0xff] %vm350_vm0, %v874_v0  ;;  %374 = vmatpush.msra.mxu0 %v357_v1  ;;  %v355_v3 = vld [vmem:[#allocation6 + $0x8] sm:$0xff]  ;;  %v354_v4 = vld [vmem:[#allocation6] sm:$0xff]  ;;  %v353_v5 = vld [vmem:[%s295_s20] sm:$0xff]  ;;  %683 = vrcp.f32 %v875_v15  ;;  %s595_s7 = sshll.u32 %s861_s24, 3  ;;  %s344_s16 = scalar_lea.vmem [#allocation9], %s1025_s13 }
  0x2e   : > { %v680_v9 = vld [vmem:[%s1098_s2] ss:$0 sm:$0xff]  ;;  %s463_s28 = scalar_lea.hbm %s1102_s6, %s595_s7  ;;  %s465_s17 = sshll.u32 %s344_s16, 4  ;;  %s466_s17 = int_to_ptr.vmem [resolvable:$true] %s465_s17 }
  0x2f   : > { %375 = vmatpush.msra.mxu0 %v356_v2  ;;  %v393_v11 = vld [vmem:[%s310_s25] sm:$0xff]  ;;  %s467_s14 = sshll.u32 %s463_s28, 4  ;;  %s453_s20 = scalar_lea.sflag [#allocation5], %s293_s12  ;;  %s468_s14 = int_to_ptr.hbm [resolvable:$true] %s467_s14 }
  0x30   : > { %v681_v49 = vld [vmem:[%s1100_s4] ss:$0 sm:$0xff]  ;;  %s793_s25 = sshra.s32 %s468_s14, 4  ;;  %s799_s13 = scalar_lea.hbm %s1102_s6, 16  ;;  %s794_s25 = int_to_ptr.hbm [resolvable:$true] %s793_s25 }
  0x31   : > { %376 = vmatpush.msra.mxu0 %v355_v3  ;;  %v682_v52 = vld [vmem:[%s1101_s5] ss:$0 sm:$0xff]  ;;  %s795_s27 = scalar_lea.hbm %s794_s25, 8  ;;  %p800_p12 = scmp.lt.s32.totalorder %s794_s25, %s1102_s6 }
  0x32   : > { %p796_p6 = scmp.ne.s32.totalorder %s794_s25, %s795_s27  ;;  %p801_p13 = scmp.lt.s32.totalorder %s799_s13, %s795_s27 }
  0x33   : > { %377 = vmatpush.msra.mxu0 %v354_v4  ;;  %v684_v16 = vpop.eup %683 }
  0x34   : > { %593 = vmatmul.msk.f32.vlgmr.msra.gmra.mxu0 %vm350_vm0, %v353_v5  ;;  %v352_v6 = vld [vmem:[#allocation2] sm:$0xff]  ;;  %v399_v17 = vmul.f32 32.0, %v684_v16  ;;  %vm403_vm1 = vweird.f32 %v684_v16  ;;  %p797_p7 = pnand %p796_p6, %p961_p8  ;;  %p802_p0 = por %p801_p13, %p800_p12 }
  0x36   : > { %v400_v18 = vsub.f32 1.0, %v399_v17  ;;  %p798_p11 = pneg %p797_p7 }
  0x38   : > { %v401_v19 = vmul.f32 %v684_v16, %v400_v18  ;;  %p803_p1 = pnand %p802_p0, %p798_p11 }
  0x3a   : > { %v402_v20 = vadd.f32 %v684_v16, %v401_v19 }
  0x3c   : > { %v404_v21 = vsel %vm403_vm1, %v684_v16, %v402_v20 }
  0xb1   : > { %v379_v7 = vpop.f32.mrf.mxu0 }
  0xb2   : > { %v382_v8 = vadd.f32 %v379_v7, %v352_v6 }
  0xb4   : > { %383 = vst.msk [vmem:[#allocation2] sm:$0xff] %vm350_vm0, %v382_v8 }
  0xbb   : > { %v387_v10 = vld [vmem:[#allocation2] sm:$0xff] }
  0xbc   : > { %v392_v12 = vadd.f32 %v680_v9, %v387_v10 }
  0xbe   : > { %v394_v13 = vadd.f32 %v393_v11, %v392_v12 }
  0xc0   : > { %v395_v14 = vsel %vm350_vm0, %v394_v13, 0.0 }
  0xc1   : > { %396 = vadd.xlane.f32.xlu0 %v395_v14 }
 0x134   : > { %v397_v22 = vpop.xlane.xlu0 %396 }
 0x135   : > { %v405_v23 = vmul.f32 %v404_v21, %v397_v22 }
 0x137   : > { %v406_v24 = vsub.f32 %v394_v13, %v405_v23 }
 0x139   : > { %v407_v25 = vmul.f32 %v406_v24, %v406_v24 }
 0x13b   : > { %v408_v26 = vsel %vm350_vm0, %v407_v25, 0.0 }
 0x13c   : > { %409 = vadd.xlane.f32.xlu0 %v408_v26 }
 0x1af   : > { %v410_v27 = vpop.xlane.xlu0 %409 }
 0x1b0   : > { %v411_v28 = vmul.f32 0.032258064, %v410_v27 }
 0x1b2   : > { %685 = vrsqrt.f32 %v411_v28  ;;  %vm419_vm2 = vcmp.eq.f32.partialorder %v411_v28, inf  ;;  %v422_v36 = vand.u32 2147483648, %v411_v28  ;;  %vm421_vm3 = vcmp.eq.f32.partialorder %v411_v28, 0.0 }
 0x1b8   : > { %v686_v29 = vpop.eup %685 }
 0x1b9   : > { %v413_v30 = vmul.f32 %v686_v29, %v411_v28 }
 0x1bb   : > { %v414_v31 = vmul.f32 %v686_v29, %v413_v30 }
 0x1bd   : > { %v415_v32 = vmul.f32 0.5, %v414_v31 }
 0x1bf   : > { %v416_v33 = vsub.f32 1.5, %v415_v32 }
 0x1c1   : > { %v417_v34 = vmul.f32 %v686_v29, %v416_v33 }
 0x1c3   : > { %v418_v35 = vmul.f32 %v417_v34, %v411_v28 }
 0x1c5   : > { %v420_v37 = vsel %vm419_vm2, %v411_v28, %v418_v35 }
 0x1c6   : > { %v423_v38 = vsel %vm421_vm3, %v422_v36, %v420_v37 }
 0x1c7   : > { %v424_v39 = vadd.f32 1e-06, %v423_v38 }
 0x1c9   : > { %687 = vrcp.f32 %v424_v39  ;;  %v436_v43 = vand.u32 2147483648, %v424_v39  ;;  %v434_v45 = vand.u32 2147483647, %v424_v39  ;;  %vm430_vm5 = vweird.f32 %v424_v39 }
 0x1cb   : > { %v437_v47 = vor.u32 1.1754944e-38, %v436_v43  ;;  %vm435_vm7 = vcmp.eq.f32.partialorder %v434_v45, 8.507059e+37 }
 0x1cf   : > { %v688_v40 = vpop.eup %687 }
 0x1d0   : > { %v426_v41 = vmul.f32 %v688_v40, %v424_v39  ;;  %vm431_vm4 = vweird.f32 %v688_v40 }
 0x1d1   : > { %vm432_vm6 = vmor %vm430_vm5, %vm431_vm4 }
 0x1d2   : > { %v427_v42 = vsub.f32 1.0, %v426_v41 }
 0x1d4   : > { %v428_v44 = vmul.f32 %v688_v40, %v427_v42 }
 0x1d6   : > { %v429_v46 = vadd.f32 %v688_v40, %v428_v44 }
 0x1d8   : > { %v433_v48 = vsel %vm432_vm6, %v688_v40, %v429_v46 }
 0x1d9   : > { %v438_v50 = vsel %vm435_vm7, %v437_v47, %v433_v48 }
 0x1da   : > { %v441_v51 = vmul.f32 %v438_v50, %v406_v24 }
 0x1dc   : > { %v445_v53 = vmul.f32 %v681_v49, %v441_v51 }
 0x1de   : > { %v450_v54 = vadd.f32 %v682_v52, %v445_v53 }
 0x1e0   : > { %451 = vst.msk [vmem:[%s344_s16] sm:$0xff] %vm350_vm0, %v450_v54 }
 0x1e1   : > { %806 = shalt.err (!%p803_p1)
}
 0x1e2   : > { %606 = dma.vmem_to_hbm [thread:$0]  (%p961_p8), %s466_s17, 128, %s468_s14, %s453_s20  }
 0x1e3 PF: > { %s479_s12 = sand.u32 1, %s849_s21   ;;  %p620_p2 = pnand %p583_p10, %p968_p9 }
 0x1e4   : > { %s480_s15 = scalar_lea.sflag [#allocation5], %s479_s12 }
 0x1e5   : > { %p621_p4 = pneg %p620_p2 }
 0x1e7   : > { %844 = dma.done.wait (%p621_p4), %s480_s15, 128  }
 0x1e8   : > { %846 = vsyncadd (%p621_p4), %s480_s15, 4294967168  ;;  %s23_s26 = sadd.s32 1, %s869_s26   ;;  %s1113_s24 = sld [smem:[#allocation14_spill]] }
 0x1e9   : > { %p20_p5 = scmp.ge.s32.totalorder %s23_s26, 4   ;;  %s1114_s25 = sld [smem:[#allocation15_spill]] }
 0x1ea   : > { %s1115_s21 = smov %s853_s22  ;;  %s1116_s22 = smov %s857_s23 }
 0x1eb   : > { %s1117_s23 = smov %s973_s11  ;;  %22 = sbr.rel (!%p20_p5) target bundleno = 7 (0x7), region = 113 }
 0x1f0   :  { %486 = vsyncpa [#allocation4], 1 }
 0x1f1   :  { %488 = vsyncpa [#allocation4 + $0x1], 1 }
 0x1f2   :  { %489 = vsyncpa [#allocation7], 1 }
 0x1f3   :  { %490 = vsyncpa [#allocation5], 1 }
 0x1f4   :  { %492 = vsyncpa [#allocation5 + $0x1], 1 }

</bundles_post_ra>
